<compile_context>
chip_gen: v6e
topology: v6e:2x2x1
jax: 0.10.0
libtpu: 0.0.40
codegen_flags: <defaults>
</compile_context>

<pallas_src>
import functools

import jax
import jax.numpy as jnp
import numpy as np
from jax.experimental import pallas as pl
from jax.experimental.pallas import tpu as pltpu


def _s2v_kernel(T, n_pre, n_post,
                xv_ref, adj_ref, xv0_ref,
                w_ref, b_ref, qreg_w_ref, head_ref, qb_ref,
                out_ref):
    """One grid step processes a tile of TB batch elements.

    xv_ref:     (TB*N, 1)     node features, batch tile flattened to rows
    adj_ref:    (TB, N, N)    adjacency matrices of the tile
    xv0_ref:    (N, 1)        node feature of GLOBAL batch element 0 (q_1 quirk)
    w_ref:      (P+Q+3, E, E) stacked square weights [pre.., post.., mu2, q1, q2]
    b_ref:      (P+Q+4, E)    stacked row biases     [mu_1, pre.., post.., mu2, q1, q2]
    qreg_w_ref: (2E, H)       q_reg weight (rows [:E] act on q1, rows [E:] on q2)
    head_ref:   (2, H)        [qreg_b ; q_w]
    qb_ref:     (1,)  SMEM    final scalar bias
    out_ref:    (1, TB, N)    q values (lane-dense; wrapper reshapes to (B,N,1))
    """
    f32 = jnp.float32
    TB, N, _ = adj_ref.shape
    E = w_ref.shape[1]
    H = qreg_w_ref.shape[1]
    R = TB * N

    i_mu2 = n_pre + n_post
    i_q1, i_q2 = i_mu2 + 1, i_mu2 + 2

    xv = xv_ref[...]                                    # (R, 1)
    mu1_row = b_ref[0:1, :]                             # (1, E)
    # relu(xv @ mu_1) with inner dim 1 == broadcast multiply; identical every t.
    mu_first = jnp.maximum(xv * mu1_row, 0.0)           # (R, E)
    mu = mu_first

    if T > 1:
        adj = adj_ref[...]                              # (TB, N, N)
        # Hoist weight/bias loads and (1,E)->(R,E) broadcasts out of the
        # unrolled T loop (JAX does not CSE broadcast_in_dim).
        pre_w = [w_ref[i] for i in range(n_pre)]
        post_w = [w_ref[n_pre + i] for i in range(n_post)]
        mu2_w = w_ref[i_mu2]
        pre_b = [jnp.broadcast_to(b_ref[1 + i:2 + i, :], (R, E))
                 for i in range(n_pre)]
        post_b = [jnp.broadcast_to(b_ref[1 + n_pre + i:2 + n_pre + i, :], (R, E))
                  for i in range(n_post)]
        mu2_b = jnp.broadcast_to(b_ref[1 + i_mu2:2 + i_mu2, :], (R, E))

        for _ in range(1, T):
            m = mu                                      # (R, E)
            for i in range(n_pre):                      # pre-pooling linears
                m = jnp.maximum(
                    jnp.dot(m, pre_w[i], preferred_element_type=f32) + pre_b[i],
                    0.0)
            # Neighborhood pooling adj[b] @ m[b], batched over the TB tile.
            pooled = jnp.einsum(
                "bnm,bme->bne", adj, m.reshape(TB, N, E),
                preferred_element_type=f32).reshape(R, E)
            for i in range(n_post):                     # post-pooling linears
                pooled = jnp.maximum(
                    jnp.dot(pooled, post_w[i], preferred_element_type=f32)
                    + post_b[i], 0.0)
            mu_2 = jnp.dot(pooled, mu2_w, preferred_element_type=f32) + mu2_b
            mu = jnp.maximum(mu_first + mu_2, 0.0)

    # ---- Q head ----
    # q_1 pools every batch element with xv of GLOBAL batch element 0
    # (PyTorch: xv[0, :, 0].reshape(1, N, 1).transpose(1, 2) @ mu).
    mu3 = mu.reshape(TB, N, E)
    pooled_q1 = jnp.sum(mu3 * xv0_ref[...][None, :, :], axis=1)       # (TB, E)
    q1 = (jnp.dot(pooled_q1, w_ref[i_q1], preferred_element_type=f32)
          + b_ref[2 + i_mu2:3 + i_mu2, :])                            # (TB, E)
    q2 = (jnp.dot(mu, w_ref[i_q2], preferred_element_type=f32)
          + b_ref[3 + i_mu2:4 + i_mu2, :])                            # (R, E)

    # relu(cat(q1, q2) @ W_reg + b_reg) via split matmul (no lane concat);
    # the q1 term broadcasts over the N rows of each batch element.
    q1h = jnp.dot(q1, qreg_w_ref[:E, :], preferred_element_type=f32)  # (TB, H)
    q2h = jnp.dot(q2, qreg_w_ref[E:, :], preferred_element_type=f32)  # (R, H)
    q_reg = jnp.maximum(q1h[:, None, :] + q2h.reshape(TB, N, H)
                        + head_ref[0:1, :][None, :, :], 0.0)          # (TB, N, H)
    # Final scalar head: lane reduction over H, plus the SMEM scalar bias.
    q_out = jnp.sum(q_reg * head_ref[1:2, :][None, :, :], axis=-1) + qb_ref[0]
    out_ref[...] = q_out[None, :, :]                                  # (1, TB, N)


def _pick_batch_tile(B, N):
    """Largest batch tile giving ~128 activation rows per grid step, a bounded
    adj VMEM footprint, and (when possible) >= 2 grid steps so both v7x
    TensorCores get work on the 'parallel' batch axis."""
    row_target = max(1, 128 // max(N, 1))
    vmem_cap = max(1, (8 * 1024 * 1024) // max(8 * N * N, 1))   # 2x-buffered f32 adj <= 8 MiB
    target = min(row_target, vmem_cap)
    divisors = [d for d in range(1, B + 1) if B % d == 0 and d <= target]
    if not divisors:
        return 1
    two_step = [d for d in divisors if B // d >= 2]
    return max(two_step) if two_step else max(divisors)


def s2v_qn1_forward(xv, adj, params, *, T, len_pre, len_post, batch_tile=None):
    B, N, _ = xv.shape
    E = params["mu_1"].shape[1]
    f32 = jnp.float32

    TB = batch_tile if batch_tile is not None else _pick_batch_tile(B, N)
    assert B % TB == 0, (B, TB)
    G = B // TB

    # Consolidate the many small weights into a few stacked operands (fewer
    # DMA descriptors / VMEM allocations than 19 separate inputs).
    w_sq = jnp.concatenate(
        [params["pre_w"].reshape(len_pre, E, E),
         params["post_w"].reshape(len_post, E, E),
         params["mu2_w"][None], params["q1_w"][None], params["q2_w"][None]],
        axis=0).astype(f32)                                 # (P+Q+3, E, E)
    b_row = jnp.concatenate(
        [params["mu_1"],
         params["pre_b"].reshape(len_pre, E),
         params["post_b"].reshape(len_post, E),
         params["mu2_b"], params["q1_b"], params["q2_b"]],
        axis=0).astype(f32)                                 # (P+Q+4, E)
    head = jnp.concatenate([params["qreg_b"], params["q_w"]], axis=0).astype(f32)  # (2, H)
    qreg_w = params["qreg_w"].astype(f32)                   # (2E, H)
    q_b = params["q_b"].reshape(1).astype(f32)              # scalar -> SMEM

    # Batch-tiled activations: TB batch elements (TB*N node rows) per step.
    xv_rows = xv.astype(f32).reshape(B * N, 1)
    # q_1 always uses xv of GLOBAL batch element 0 (PyTorch quirk).  NOTE: if
    # this wrapper is ever vmapped/sharded over batch, xv0 must still come
    # from the global batch element 0.
    xv0 = xv[0].astype(f32)                                 # (N, 1)
    adj_f = adj.astype(f32)

    kernel = functools.partial(_s2v_kernel, T, len_pre, len_post)
    vmem = pl.BlockSpec(memory_space=pltpu.MemorySpace.VMEM)  # grid-invariant, whole array
    smem = pl.BlockSpec(memory_space=pltpu.MemorySpace.SMEM)

    out = pl.pallas_call(
        kernel,
        out_shape=jax.ShapeDtypeStruct((G, TB, N), f32),     # lane-dense (no trailing 1)
        grid_spec=pltpu.PrefetchScalarGridSpec(
            num_scalar_prefetch=0,
            grid=(G,),
            in_specs=[
                pl.BlockSpec((TB * N, 1), lambda b: (b, 0)),    # xv rows of tile b
                pl.BlockSpec((TB, N, N), lambda b: (b, 0, 0)),  # adj of tile b
                vmem,    # xv0
                vmem,    # stacked (E, E) weights
                vmem,    # stacked row biases (+ mu_1)
                vmem,    # q_reg weight (2E, H)
                vmem,    # [qreg_b ; q_w]
                smem,    # final scalar bias
            ],
            out_specs=pl.BlockSpec((1, TB, N), lambda b: (b, 0, 0)),
        ),
        compiler_params=pltpu.CompilerParams(
            dimension_semantics=("parallel",)),
    )(xv_rows, adj_f, xv0, w_sq, b_row, qreg_w, head, q_b)

    return out.reshape(B, N, 1)


def reference(xv, adj, params, T, P, Q):
    """Plain-JAX replica of the PyTorch forward (weights already transposed)."""
    B, N, _ = xv.shape
    E = params["mu_1"].shape[1]
    mu_first = jnp.maximum(xv @ params["mu_1"], 0.0)            # (B, N, E)
    mu = mu_first
    for _ in range(1, T):
        m = mu
        for i in range(P):
            m = jnp.maximum(m @ params["pre_w"][i] + params["pre_b"][i], 0.0)
        mu_pool = adj @ m
        for i in range(Q):
            mu_pool = jnp.maximum(mu_pool @ params["post_w"][i] + params["post_b"][i], 0.0)
        mu2 = mu_pool @ params["mu2_w"] + params["mu2_b"]
        mu = jnp.maximum(mu_first + mu2, 0.0)
    xv0 = xv[0, :, 0]                                           # (N,)
    pooled = jnp.einsum("n,bne->be", xv0, mu)[:, None, :]       # (B, 1, E)
    q1 = pooled @ params["q1_w"] + params["q1_b"]               # (B, 1, E)
    q2 = mu @ params["q2_w"] + params["q2_b"]                   # (B, N, E)
    q_cat = jnp.concatenate([jnp.broadcast_to(q1, (B, N, E)), q2], axis=-1)
    q_reg = jnp.maximum(q_cat @ params["qreg_w"] + params["qreg_b"], 0.0)
    q = jnp.sum(q_reg * params["q_w"], axis=-1, keepdims=True) + params["q_b"]
    return q


if __name__ == "__main__":
    # Module hyperparameters (small, exercising all branches: T>1, pre/post
    # pooling layers present, reg_hidden > 0; B=8 gives a batch-tiled grid of
    # 2 steps with TB=4 -> 32-row matmuls per step).
    B, N, E, H = 8, 8, 32, 16
    T, P, Q = 3, 1, 1

    key = jax.random.PRNGKey(0)
    ks = jax.random.split(key, 17)
    f = jnp.float32
    params = dict(
        mu_1=0.01 * jax.random.normal(ks[0], (1, E), f),
        mu2_w=0.01 * jax.random.normal(ks[1], (E, E), f),
        mu2_b=0.10 * jax.random.normal(ks[2], (1, E), f),
        pre_w=0.01 * jax.random.normal(ks[3], (P, E, E), f),
        pre_b=0.10 * jax.random.normal(ks[4], (P, E), f),
        post_w=0.01 * jax.random.normal(ks[5], (Q, E, E), f),
        post_b=0.10 * jax.random.normal(ks[6], (Q, E), f),
        q1_w=0.01 * jax.random.normal(ks[7], (E, E), f),
        q1_b=0.10 * jax.random.normal(ks[8], (1, E), f),
        q2_w=0.01 * jax.random.normal(ks[9], (E, E), f),
        q2_b=0.10 * jax.random.normal(ks[10], (1, E), f),
        qreg_w=0.01 * jax.random.normal(ks[11], (2 * E, H), f),   # q_reg.weight.T
        qreg_b=0.10 * jax.random.normal(ks[12], (1, H), f),
        q_w=0.01 * jax.random.normal(ks[13], (1, H), f),          # q.weight
        q_b=0.10 * jax.random.normal(ks[14], (1, 1), f),
    )
    xv = jax.random.uniform(ks[15], (B, N, 1), f)
    adj = (jax.random.uniform(ks[16], (B, N, N), f) > 0.5).astype(f)

    out = s2v_qn1_forward(xv, adj, params, T=T, len_pre=P, len_post=Q)
    jax.block_until_ready(out)

    ref = reference(xv, adj, params, T, P, Q)
    np.testing.assert_allclose(np.asarray(out), np.asarray(ref),
                               rtol=1e-5, atol=1e-5)
    print("KERNEL_OK")
</pallas_src>

<mosaic_0001>
module attributes {stable_mosaic.version = 11 : i64} {
  func.func @_s2v_kernel(%arg0: i32, %arg1: memref<32x1xf32, #tpu.memory_space<vmem>>, %arg2: memref<4x8x8xf32, #tpu.memory_space<vmem>>, %arg3: memref<8x1xf32, #tpu.memory_space<vmem>>, %arg4: memref<5x32x32xf32, #tpu.memory_space<vmem>>, %arg5: memref<6x32xf32, #tpu.memory_space<vmem>>, %arg6: memref<64x16xf32, #tpu.memory_space<vmem>>, %arg7: memref<2x16xf32, #tpu.memory_space<vmem>>, %arg8: memref<1xf32, #tpu.memory_space<smem>>, %arg9: memref<1x4x8xf32, #tpu.memory_space<vmem>>) attributes {dimension_semantics = [#tpu.dimension_semantics<parallel>], iteration_bounds = array<i64: 2>, scalar_prefetch = 0 : i64, scratch_operands = 0 : i64, tpu.core_type = #tpu.core_type<tc>, window_params = [{transform_indices = @transform_0, window_bounds = array<i64: 32, 1>}, {transform_indices = @transform_1, window_bounds = array<i64: 4, 8, 8>}, {pipeline_mode = #tpu.pipeline_mode<synchronous>, transform_indices = @transform_2, window_bounds = array<i64: 8, 1>}, {pipeline_mode = #tpu.pipeline_mode<synchronous>, transform_indices = @transform_3, window_bounds = array<i64: 5, 32, 32>}, {pipeline_mode = #tpu.pipeline_mode<synchronous>, transform_indices = @transform_4, window_bounds = array<i64: 6, 32>}, {pipeline_mode = #tpu.pipeline_mode<synchronous>, transform_indices = @transform_5, window_bounds = array<i64: 64, 16>}, {pipeline_mode = #tpu.pipeline_mode<synchronous>, transform_indices = @transform_6, window_bounds = array<i64: 2, 16>}, {transform_indices = @transform_7, window_bounds = array<i64: 1>}, {transform_indices = @transform_8, window_bounds = array<i64: 1, 4, 8>}]} {
    %c0 = arith.constant 0 : index
    %c0_0 = arith.constant 0 : index
    %0 = vector.load %arg1[%c0, %c0_0] : memref<32x1xf32, #tpu.memory_space<vmem>>, vector<32x1xf32>
    %c0_1 = arith.constant 0 : index
    %c0_2 = arith.constant 0 : index
    %1 = vector.load %arg5[%c0_1, %c0_2] : memref<6x32xf32, #tpu.memory_space<vmem>>, vector<1x32xf32>
    %2 = vector.broadcast %0 : vector<32x1xf32> to vector<32x32xf32>
    %3 = vector.broadcast %1 : vector<1x32xf32> to vector<32x32xf32>
    %4 = arith.mulf %2, %3 : vector<32x32xf32>
    %cst = arith.constant 0.000000e+00 : f32
    %5 = vector.broadcast %cst : f32 to vector<32x32xf32>
    %6 = arith.maximumf %4, %5 : vector<32x32xf32>
    %c0_3 = arith.constant 0 : index
    %c0_4 = arith.constant 0 : index
    %c0_5 = arith.constant 0 : index
    %7 = vector.load %arg2[%c0_3, %c0_4, %c0_5] : memref<4x8x8xf32, #tpu.memory_space<vmem>>, vector<4x8x8xf32>
    %c0_6 = arith.constant 0 : index
    %c0_7 = arith.constant 0 : index
    %c0_8 = arith.constant 0 : index
    %8 = vector.load %arg4[%c0_6, %c0_7, %c0_8] : memref<5x32x32xf32, #tpu.memory_space<vmem>>, vector<1x32x32xf32>
    %9 = vector.shape_cast %8 : vector<1x32x32xf32> to vector<32x32xf32>
    %c1 = arith.constant 1 : index
    %c0_9 = arith.constant 0 : index
    %c0_10 = arith.constant 0 : index
    %10 = vector.load %arg4[%c1, %c0_9, %c0_10] : memref<5x32x32xf32, #tpu.memory_space<vmem>>, vector<1x32x32xf32>
    %11 = vector.shape_cast %10 : vector<1x32x32xf32> to vector<32x32xf32>
    %c2 = arith.constant 2 : index
    %c0_11 = arith.constant 0 : index
    %c0_12 = arith.constant 0 : index
    %12 = vector.load %arg4[%c2, %c0_11, %c0_12] : memref<5x32x32xf32, #tpu.memory_space<vmem>>, vector<1x32x32xf32>
    %13 = vector.shape_cast %12 : vector<1x32x32xf32> to vector<32x32xf32>
    %c1_13 = arith.constant 1 : index
    %c0_14 = arith.constant 0 : index
    %14 = vector.load %arg5[%c1_13, %c0_14] : memref<6x32xf32, #tpu.memory_space<vmem>>, vector<1x32xf32>
    %15 = vector.shape_cast %14 : vector<1x32xf32> to vector<1x32xf32>
    %16 = vector.broadcast %15 : vector<1x32xf32> to vector<32x32xf32>
    %c2_15 = arith.constant 2 : index
    %c0_16 = arith.constant 0 : index
    %17 = vector.load %arg5[%c2_15, %c0_16] : memref<6x32xf32, #tpu.memory_space<vmem>>, vector<1x32xf32>
    %18 = vector.shape_cast %17 : vector<1x32xf32> to vector<1x32xf32>
    %19 = vector.broadcast %18 : vector<1x32xf32> to vector<32x32xf32>
    %c3 = arith.constant 3 : index
    %c0_17 = arith.constant 0 : index
    %20 = vector.load %arg5[%c3, %c0_17] : memref<6x32xf32, #tpu.memory_space<vmem>>, vector<1x32xf32>
    %21 = vector.shape_cast %20 : vector<1x32xf32> to vector<1x32xf32>
    %22 = vector.broadcast %21 : vector<1x32xf32> to vector<32x32xf32>
    %cst_18 = arith.constant dense<0.000000e+00> : vector<32x32xf32>
    %23 = tpu.matmul %6, %9, %cst_18 {dimension_numbers = #tpu.dot_dimension_numbers<[1], [0], [0], [1], [0, 0, 1, 1], [], []>} : vector<32x32xf32>, vector<32x32xf32>, vector<32x32xf32> -> vector<32x32xf32>
    %24 = arith.addf %23, %16 : vector<32x32xf32>
    %cst_19 = arith.constant 0.000000e+00 : f32
    %25 = vector.broadcast %cst_19 : f32 to vector<32x32xf32>
    %26 = arith.maximumf %24, %25 : vector<32x32xf32>
    %27 = vector.shape_cast %26 : vector<32x32xf32> to vector<4x8x32xf32>
    "tpu.trace_start"() <{level = 10 : i32, message = "bnm,bme->bne"}> : () -> ()
    %cst_20 = arith.constant dense<0.000000e+00> : vector<4x8x32xf32>
    %28 = tpu.matmul %7, %27, %cst_20 {dimension_numbers = #tpu.dot_dimension_numbers<[2], [1], [1], [2], [0, 0, 0, 1, 1, 2], [0], [0]>} : vector<4x8x8xf32>, vector<4x8x32xf32>, vector<4x8x32xf32> -> vector<4x8x32xf32>
    "tpu.trace_stop"() : () -> ()
    %29 = vector.shape_cast %28 : vector<4x8x32xf32> to vector<32x32xf32>
    %cst_21 = arith.constant dense<0.000000e+00> : vector<32x32xf32>
    %30 = tpu.matmul %29, %11, %cst_21 {dimension_numbers = #tpu.dot_dimension_numbers<[1], [0], [0], [1], [0, 0, 1, 1], [], []>} : vector<32x32xf32>, vector<32x32xf32>, vector<32x32xf32> -> vector<32x32xf32>
    %31 = arith.addf %30, %19 : vector<32x32xf32>
    %cst_22 = arith.constant 0.000000e+00 : f32
    %32 = vector.broadcast %cst_22 : f32 to vector<32x32xf32>
    %33 = arith.maximumf %31, %32 : vector<32x32xf32>
    %cst_23 = arith.constant dense<0.000000e+00> : vector<32x32xf32>
    %34 = tpu.matmul %33, %13, %cst_23 {dimension_numbers = #tpu.dot_dimension_numbers<[1], [0], [0], [1], [0, 0, 1, 1], [], []>} : vector<32x32xf32>, vector<32x32xf32>, vector<32x32xf32> -> vector<32x32xf32>
    %35 = arith.addf %34, %22 : vector<32x32xf32>
    %36 = arith.addf %6, %35 : vector<32x32xf32>
    %cst_24 = arith.constant 0.000000e+00 : f32
    %37 = vector.broadcast %cst_24 : f32 to vector<32x32xf32>
    %38 = arith.maximumf %36, %37 : vector<32x32xf32>
    %cst_25 = arith.constant dense<0.000000e+00> : vector<32x32xf32>
    %39 = tpu.matmul %38, %9, %cst_25 {dimension_numbers = #tpu.dot_dimension_numbers<[1], [0], [0], [1], [0, 0, 1, 1], [], []>} : vector<32x32xf32>, vector<32x32xf32>, vector<32x32xf32> -> vector<32x32xf32>
    %40 = arith.addf %39, %16 : vector<32x32xf32>
    %cst_26 = arith.constant 0.000000e+00 : f32
    %41 = vector.broadcast %cst_26 : f32 to vector<32x32xf32>
    %42 = arith.maximumf %40, %41 : vector<32x32xf32>
    %43 = vector.shape_cast %42 : vector<32x32xf32> to vector<4x8x32xf32>
    "tpu.trace_start"() <{level = 10 : i32, message = "bnm,bme->bne"}> : () -> ()
    %cst_27 = arith.constant dense<0.000000e+00> : vector<4x8x32xf32>
    %44 = tpu.matmul %7, %43, %cst_27 {dimension_numbers = #tpu.dot_dimension_numbers<[2], [1], [1], [2], [0, 0, 0, 1, 1, 2], [0], [0]>} : vector<4x8x8xf32>, vector<4x8x32xf32>, vector<4x8x32xf32> -> vector<4x8x32xf32>
    "tpu.trace_stop"() : () -> ()
    %45 = vector.shape_cast %44 : vector<4x8x32xf32> to vector<32x32xf32>
    %cst_28 = arith.constant dense<0.000000e+00> : vector<32x32xf32>
    %46 = tpu.matmul %45, %11, %cst_28 {dimension_numbers = #tpu.dot_dimension_numbers<[1], [0], [0], [1], [0, 0, 1, 1], [], []>} : vector<32x32xf32>, vector<32x32xf32>, vector<32x32xf32> -> vector<32x32xf32>
    %47 = arith.addf %46, %19 : vector<32x32xf32>
    %cst_29 = arith.constant 0.000000e+00 : f32
    %48 = vector.broadcast %cst_29 : f32 to vector<32x32xf32>
    %49 = arith.maximumf %47, %48 : vector<32x32xf32>
    %cst_30 = arith.constant dense<0.000000e+00> : vector<32x32xf32>
    %50 = tpu.matmul %49, %13, %cst_30 {dimension_numbers = #tpu.dot_dimension_numbers<[1], [0], [0], [1], [0, 0, 1, 1], [], []>} : vector<32x32xf32>, vector<32x32xf32>, vector<32x32xf32> -> vector<32x32xf32>
    %51 = arith.addf %50, %22 : vector<32x32xf32>
    %52 = arith.addf %6, %51 : vector<32x32xf32>
    %cst_31 = arith.constant 0.000000e+00 : f32
    %53 = vector.broadcast %cst_31 : f32 to vector<32x32xf32>
    %54 = arith.maximumf %52, %53 : vector<32x32xf32>
    %55 = vector.shape_cast %54 : vector<32x32xf32> to vector<4x8x32xf32>
    %c0_32 = arith.constant 0 : index
    %c0_33 = arith.constant 0 : index
    %56 = vector.load %arg3[%c0_32, %c0_33] : memref<8x1xf32, #tpu.memory_space<vmem>>, vector<8x1xf32>
    %57 = vector.shape_cast %56 : vector<8x1xf32> to vector<1x8x1xf32>
    %58 = vector.broadcast %57 : vector<1x8x1xf32> to vector<4x8x32xf32>
    %59 = arith.mulf %55, %58 : vector<4x8x32xf32>
    %cst_34 = arith.constant dense<0.000000e+00> : vector<4x32xf32>
    %60 = vector.multi_reduction <add>, %59, %cst_34 [1] : vector<4x8x32xf32> to vector<4x32xf32>
    %c3_35 = arith.constant 3 : index
    %c0_36 = arith.constant 0 : index
    %c0_37 = arith.constant 0 : index
    %61 = vector.load %arg4[%c3_35, %c0_36, %c0_37] : memref<5x32x32xf32, #tpu.memory_space<vmem>>, vector<1x32x32xf32>
    %62 = vector.shape_cast %61 : vector<1x32x32xf32> to vector<32x32xf32>
    %cst_38 = arith.constant dense<0.000000e+00> : vector<4x32xf32>
    %63 = tpu.matmul %60, %62, %cst_38 {dimension_numbers = #tpu.dot_dimension_numbers<[1], [0], [0], [1], [0, 0, 1, 1], [], []>} : vector<4x32xf32>, vector<32x32xf32>, vector<4x32xf32> -> vector<4x32xf32>
    %c4 = arith.constant 4 : index
    %c0_39 = arith.constant 0 : index
    %64 = vector.load %arg5[%c4, %c0_39] : memref<6x32xf32, #tpu.memory_space<vmem>>, vector<1x32xf32>
    %65 = vector.broadcast %64 : vector<1x32xf32> to vector<4x32xf32>
    %66 = arith.addf %63, %65 : vector<4x32xf32>
    %c4_40 = arith.constant 4 : index
    %c0_41 = arith.constant 0 : index
    %c0_42 = arith.constant 0 : index
    %67 = vector.load %arg4[%c4_40, %c0_41, %c0_42] : memref<5x32x32xf32, #tpu.memory_space<vmem>>, vector<1x32x32xf32>
    %68 = vector.shape_cast %67 : vector<1x32x32xf32> to vector<32x32xf32>
    %cst_43 = arith.constant dense<0.000000e+00> : vector<32x32xf32>
    %69 = tpu.matmul %54, %68, %cst_43 {dimension_numbers = #tpu.dot_dimension_numbers<[1], [0], [0], [1], [0, 0, 1, 1], [], []>} : vector<32x32xf32>, vector<32x32xf32>, vector<32x32xf32> -> vector<32x32xf32>
    %c5 = arith.constant 5 : index
    %c0_44 = arith.constant 0 : index
    %70 = vector.load %arg5[%c5, %c0_44] : memref<6x32xf32, #tpu.memory_space<vmem>>, vector<1x32xf32>
    %71 = vector.broadcast %70 : vector<1x32xf32> to vector<32x32xf32>
    %72 = arith.addf %69, %71 : vector<32x32xf32>
    %c0_45 = arith.constant 0 : index
    %c0_46 = arith.constant 0 : index
    %73 = vector.load %arg6[%c0_45, %c0_46] : memref<64x16xf32, #tpu.memory_space<vmem>>, vector<32x16xf32>
    %cst_47 = arith.constant dense<0.000000e+00> : vector<4x16xf32>
    %74 = tpu.matmul %66, %73, %cst_47 {dimension_numbers = #tpu.dot_dimension_numbers<[1], [0], [0], [1], [0, 0, 1, 1], [], []>} : vector<4x32xf32>, vector<32x16xf32>, vector<4x16xf32> -> vector<4x16xf32>
    %c32 = arith.constant 32 : index
    %c0_48 = arith.constant 0 : index
    %75 = vector.load %arg6[%c32, %c0_48] : memref<64x16xf32, #tpu.memory_space<vmem>>, vector<32x16xf32>
    %cst_49 = arith.constant dense<0.000000e+00> : vector<32x16xf32>
    %76 = tpu.matmul %72, %75, %cst_49 {dimension_numbers = #tpu.dot_dimension_numbers<[1], [0], [0], [1], [0, 0, 1, 1], [], []>} : vector<32x32xf32>, vector<32x16xf32>, vector<32x16xf32> -> vector<32x16xf32>
    %77 = vector.shape_cast %74 : vector<4x16xf32> to vector<4x1x16xf32>
    %78 = vector.shape_cast %76 : vector<32x16xf32> to vector<4x8x16xf32>
    %79 = vector.broadcast %77 : vector<4x1x16xf32> to vector<4x8x16xf32>
    %80 = arith.addf %79, %78 : vector<4x8x16xf32>
    %c0_50 = arith.constant 0 : index
    %c0_51 = arith.constant 0 : index
    %81 = vector.load %arg7[%c0_50, %c0_51] : memref<2x16xf32, #tpu.memory_space<vmem>>, vector<1x16xf32>
    %82 = vector.shape_cast %81 : vector<1x16xf32> to vector<1x1x16xf32>
    %83 = vector.broadcast %82 : vector<1x1x16xf32> to vector<4x8x16xf32>
    %84 = arith.addf %80, %83 : vector<4x8x16xf32>
    %cst_52 = arith.constant 0.000000e+00 : f32
    %85 = vector.broadcast %cst_52 : f32 to vector<4x8x16xf32>
    %86 = arith.maximumf %84, %85 : vector<4x8x16xf32>
    %c1_53 = arith.constant 1 : index
    %c0_54 = arith.constant 0 : index
    %87 = vector.load %arg7[%c1_53, %c0_54] : memref<2x16xf32, #tpu.memory_space<vmem>>, vector<1x16xf32>
    %88 = vector.shape_cast %87 : vector<1x16xf32> to vector<1x1x16xf32>
    %89 = vector.broadcast %88 : vector<1x1x16xf32> to vector<4x8x16xf32>
    %90 = arith.mulf %86, %89 : vector<4x8x16xf32>
    %cst_55 = arith.constant dense<0.000000e+00> : vector<4x8xf32>
    %91 = vector.multi_reduction <add>, %90, %cst_55 [2] : vector<4x8x16xf32> to vector<4x8xf32>
    %c0_56 = arith.constant 0 : index
    %92 = memref.load %arg8[%c0_56] : memref<1xf32, #tpu.memory_space<smem>>
    %93 = vector.broadcast %92 : f32 to vector<4x8xf32>
    %94 = arith.addf %91, %93 : vector<4x8xf32>
    %95 = vector.shape_cast %94 : vector<4x8xf32> to vector<1x4x8xf32>
    %c0_57 = arith.constant 0 : index
    %c0_58 = arith.constant 0 : index
    %c0_59 = arith.constant 0 : index
    %96 = vector.load %arg9[%c0_57, %c0_58, %c0_59] : memref<1x4x8xf32, #tpu.memory_space<vmem>>, vector<1x4x8xf32>
    tpu.vector_store %arg9[%c0_57, %c0_58, %c0_59], %95 {strides = array<i32>} : memref<1x4x8xf32, #tpu.memory_space<vmem>>, vector<1x4x8xf32>,
    return
  }
  func.func @transform_0(%arg0: i32) -> (i32, i32) {
    %c0_i32 = arith.constant 0 : i32
    %c0_i32_0 = arith.constant 0 : i32
    return %arg0, %c0_i32 : i32, i32
  }
  func.func @transform_1(%arg0: i32) -> (i32, i32, i32) {
    %c0_i32 = arith.constant 0 : i32
    %c0_i32_0 = arith.constant 0 : i32
    %c0_i32_1 = arith.constant 0 : i32
    return %arg0, %c0_i32, %c0_i32_0 : i32, i32, i32
  }
  func.func @transform_2(%arg0: i32) -> (i32, i32) {
    %c0_i32 = arith.constant 0 : i32
    %c0_i32_0 = arith.constant 0 : i32
    %c0_i32_1 = arith.constant 0 : i32
    return %c0_i32, %c0_i32_0 : i32, i32
  }
  func.func @transform_3(%arg0: i32) -> (i32, i32, i32) {
    %c0_i32 = arith.constant 0 : i32
    %c0_i32_0 = arith.constant 0 : i32
    %c0_i32_1 = arith.constant 0 : i32
    %c0_i32_2 = arith.constant 0 : i32
    return %c0_i32, %c0_i32_0, %c0_i32_1 : i32, i32, i32
  }
  func.func @transform_4(%arg0: i32) -> (i32, i32) {
    %c0_i32 = arith.constant 0 : i32
    %c0_i32_0 = arith.constant 0 : i32
    %c0_i32_1 = arith.constant 0 : i32
    return %c0_i32, %c0_i32_0 : i32, i32
  }
  func.func @transform_5(%arg0: i32) -> (i32, i32) {
    %c0_i32 = arith.constant 0 : i32
    %c0_i32_0 = arith.constant 0 : i32
    %c0_i32_1 = arith.constant 0 : i32
    return %c0_i32, %c0_i32_0 : i32, i32
  }
  func.func @transform_6(%arg0: i32) -> (i32, i32) {
    %c0_i32 = arith.constant 0 : i32
    %c0_i32_0 = arith.constant 0 : i32
    %c0_i32_1 = arith.constant 0 : i32
    return %c0_i32, %c0_i32_0 : i32, i32
  }
  func.func @transform_7(%arg0: i32) -> i32 {
    %c0_i32 = arith.constant 0 : i32
    %c0_i32_0 = arith.constant 0 : i32
    return %c0_i32 : i32
  }
  func.func @transform_8(%arg0: i32) -> (i32, i32, i32) {
    %c0_i32 = arith.constant 0 : i32
    %c0_i32_0 = arith.constant 0 : i32
    %c0_i32_1 = arith.constant 0 : i32
    return %arg0, %c0_i32, %c0_i32_0 : i32, i32, i32
  }
}

</mosaic_0001>

<bundles_post_ra>
// kernel: tpu_custom_call.1
= control target key start
LH: loop header
LB: loop body
LE: loop exit
PB: predicated region body
PF: predicated region fallthrough
CT: control target
= control target key end

     0   :  { %s3377_s0 = inlined_call_operand.vmem [shape: f32[64,1], index: 0, kind: input, shape index: {}]   ;;  %s3378_s1 = inlined_call_operand.hbm [shape: f32[8,8,8], index: 1, kind: input, shape index: {}]   ;;  %s3379_s2 = inlined_call_operand.vmem [shape: f32[8,1], index: 2, kind: input, shape index: {}]   ;;  %s3380_s3 = inlined_call_operand.vmem [shape: f32[5,32,32], index: 3, kind: input, shape index: {}]   ;;  %s3381_s4 = inlined_call_operand.hbm [shape: f32[6,32], index: 4, kind: input, shape index: {}]   ;;  %s3382_s5 = inlined_call_operand.vmem [shape: f32[64,16], index: 5, kind: input, shape index: {}]   ;;  %s3383_s6 = inlined_call_operand.vmem [shape: f32[2,16], index: 6, kind: input, shape index: {}]   ;;  %s3384_s7 = inlined_call_operand.<no memory space> [shape: f32[1], index: 7, kind: input, shape index: {}]   ;;  %s3385_s8 = inlined_call_operand.hbm [shape: f32[2,4,8], index: 8, kind: output, shape index: {}]  }
   0x1   :  { %13 = sst [smem:[#allocation2]] %s3384_s7 }
   0x2   :  { %14 = vsyncpa [#allocation4], 0 }
   0x3   :  { %16 = vsyncpa [#allocation4 + $0x1], 0 }
   0x4   :  { %17 = vsyncpa [#allocation7], 0 }
   0x5   :  { %18 = vsyncpa [#allocation5], 0 }
   0x6   :  { %20 = vsyncpa [#allocation5 + $0x1], 0  ;;  %s2860_s29 = smov 0   ;;  %s2862_s30 = smov 0  }
   0x7   :  { %s2864_s9 = smov 0   ;;  %s2866_s10 = smov 0  }
   0x8 LB: > { %3391 = sst [smem:[#allocation12_spill]] %s2797_s9  ;;  %s2881_s7 = sadd.s32 4294967295, %s2801_s10   ;;  %s2801_s10 = sphi %s2866_s10, %s3412_s10   ;;  %s2797_s9 = sphi %s2864_s9, %s3409_s9   ;;  %s2793_s30 = sphi %s2862_s30, %s3411_s30   ;;  %s2789_s29 = sphi %s2860_s29, %s3410_s29  }
   0x9   : > { %s2258_s11 = sadd.s32 4294967294, %s2801_s10   ;;  %s2885_s12 = sadd.s32 1, %s2801_s10  }
   0xa   : > { %s59_s13 = sadd.s32 1, %s2797_s9  ;;  %s56_s14 = ssub.s32 %s2801_s10, %s2885_s12 }
   0xb   : > { %p66_p0 = scmp.ne.s32.totalorder %s2797_s9, %s2793_s30  ;;  %p57_p1 = scmp.eq.s32.totalorder %s56_s14, 0 }
   0xc   : > { %p67_p2 = scmp.eq.s32.totalorder %s2801_s10, 0  ;;  %p72_p3 = scmp.ne.s32.totalorder %s2793_s30, %s2789_s29 }
   0xd   : > { %p3386_p4 = scmp.eq.s32.totalorder %s2881_s7, 0  ;;  %p222_p7 = scmp.eq.s32.totalorder %s2881_s7, 1 }
   0xe   : > { %s2897_s15 = scalar_select %p57_p1, %s2797_s9, %s59_s13  }
   0xf   : > { %p2899_p5 = por %p67_p2, %p66_p0  ;;  %p2905_p6 = por %p3386_p4, %p72_p3 }
  0x10   : > { %3392 = sst [smem:[#allocation13_spill]] %s2897_s15  ;;  %p228_p8 = scmp.eq.s32.totalorder %s2258_s11, 1 }
  0x11   : > { %s3394_s17 = scalar_select %p2905_p6, 1, 0 }
  0x12   : > { %p2259_p9 = scmp.ge.s32.totalorder %s2801_s10, 1  ;;  %p235_p10 = scmp.lt.s32.totalorder %s2801_s10, 3 }
  0x13   : > { %p2912_p11 = por %p222_p7, %p66_p0  ;;  %p2916_p12 = por %p228_p8, %p72_p3 }
  0x14   : > { %p2920_p13 = pnand %p2259_p9, %p235_p10  ;;  %s2803_s21 = smov [#allocation6]  }
  0x15   : > { %s3395_s18 = scalar_select %p2912_p11, 1, 0 }
  0x16   : > { %s3396_s19 = scalar_select %p2916_p12, 1, 0 }
  0x17   : > { %s3397_s20 = scalar_select %p2920_p13, 1, 0 }
  0x18   : > { %p2622_p2 = pneg %p2920_p13  ;;  %s254_s22 = sshll.u32 %s2803_s21, 4  ;;  %s255_s22 = int_to_ptr.vmem [resolvable:$true] %s254_s22 }
  0x19   : > { %p2635_p4 = scmp.lt.s32.totalorder %s2801_s10, 2  ;;  %p3398_p0 = scmp.eq.s32.totalorder %s2881_s7, 0 }
  0x1a   : > { %s283_s24 = sand.u32 1, %s2797_s9   ;;  %s2690_s27 = scalar_lea.vmem %s255_s22, 128 }
  0x1b   : > { %p2930_p7 = pnand %p2622_p2, %p3398_p0  ;;  %p2937_p3 = pnand %p2635_p4, %p2899_p5 }
  0x1c   : > { %s2262_s26 = sshll.u32 %s283_s24, 5  ;;  %p2691_p9 = scmp.ne.s32.totalorder %s255_s22, %s2690_s27 }
  0x1d   : > { %p2681_p8 = pneg %p2930_p7  ;;  %p2698_p12 = scmp.lt.s32.totalorder %s255_s22, %s255_s22 }
  0x1e   : > { %p2699_p11 = scmp.lt.s32.totalorder %s2690_s27, %s2690_s27 }
  0x1f   : > { %p2693_p10 = pnand %p2691_p9, %p2681_p8 }
  0x20   : > { %p2700_p2 = por %p2699_p11, %p2698_p12 }
  0x21   : > { %p2694_p1 = pneg %p2693_p10 }
  0x23   : > { %p2701_p0 = pnand %p2700_p2, %p2694_p1 }
  0x25   : > { %2704 = shalt.err (!%p2701_p0)
}
  0x26   : > { %2625 = dma.hbm_to_vmem [thread:$0]  (!%p2930_p7), %s3381_s4, 128, %s255_s22, [#allocation7]  }
  0x27   : > { %s2341_s13 = sshll.u32 %s2801_s10, 9  ;;  %s287_s14 = scalar_lea.vmem [#allocation3], %s2262_s26 }
  0x28   : > { %s294_s16 = sshll.u32 %s287_s14, 4  ;;  %s2952_s9 = scalar_lea.hbm %s3378_s1, %s2341_s13  ;;  %s2954_s16 = int_to_ptr.vmem [resolvable:$true] %s294_s16 }
  0x29   : > { %s2956_s23 = scalar_lea.sflag [#allocation4], %s283_s24  ;;  %s2705_s27 = scalar_lea.hbm %s2952_s9, 512 }
  0x2a   : > { %p2706_p4 = scmp.ne.s32.totalorder %s2952_s9, %s2705_s27  ;;  %p2707_p5 = pneg %p2937_p3 }
  0x2b   : > { %s2710_s28 = scalar_lea.hbm %s3378_s1, 1024  ;;  %p2711_p1 = scmp.lt.s32.totalorder %s2952_s9, %s3378_s1 }
  0x2c   : > { %p2708_p11 = pnand %p2707_p5, %p2706_p4  ;;  %p2712_p7 = scmp.lt.s32.totalorder %s2710_s28, %s2705_s27 }
  0x2e   : > { %p2709_p12 = pneg %p2708_p11  ;;  %p2713_p8 = por %p2712_p7, %p2711_p1 }
  0x30   : > { %p2714_p9 = pnand %p2713_p8, %p2709_p12 }
  0x32   : > { %2717 = shalt.err (!%p2714_p9)
}
  0x33   : > { %s2718_s24 = scalar_lea.vmem %s2954_s16, 512  ;;  %s2804_s13 = smov [#allocation3]  }
  0x34   : > { %p2719_p10 = scmp.ne.s32.totalorder %s2954_s16, %s2718_s24  ;;  %s2723_s14 = sshll.u32 %s2804_s13, 4  ;;  %s2724_s14 = int_to_ptr.vmem [resolvable:$false] %s2723_s14 }
  0x35   : > { %s2725_s21 = scalar_lea.vmem %s2724_s14, 1024  ;;  %p2726_p4 = scmp.lt.s32.totalorder %s2954_s16, %s2724_s14 }
  0x36   : > { %p2721_p2 = pnand %p2719_p10, %p2707_p5  ;;  %p2727_p11 = scmp.lt.s32.totalorder %s2725_s21, %s2718_s24 }
  0x38   : > { %p2722_p0 = pneg %p2721_p2  ;;  %p2728_p6 = por %p2727_p11, %p2726_p4 }
  0x3a   : > { %p2729_p13 = pnand %p2728_p6, %p2722_p0 }
  0x3c   : > { %2732 = shalt.err (!%p2729_p13)
}
  0x3d   : > { %s2805_s27 = smov 128   ;;  %s2806_s22 = smov 8  }
  0x3e   : > { %2629 = dma.hbm_to_vmem [thread:$0]  (!%p2937_p3), %s2952_s9, 512, %s2954_s16, %s2956_s23, %s2805_s27, %s2805_s27, %s2806_s22  }
  0x3f   : > { %p3401_p5 = scmp.ne.s32.totalorder %s3397_s20, 0 }
  0x40   : > { %s2980_s26 = sand.u32 (!%p3401_p5), 1, %s2793_s30   ;;  %p3402_p6 = scmp.ne.s32.totalorder (!%p3401_p5), %s3394_s17, 0 }
  0x41   : > { %306 = sbr.rel (%p3401_p5) target bundleno = 2398 (0x95e), region = 52  ;;  %s2266_s28 = sshll.u32 (!%p3401_p5), %s2980_s26, 5 }
  0x42   : > { %s309_s15 = scalar_lea.sflag (!%p3401_p5), [#allocation4], %s2980_s26  ;;  %s2984_s11 = scalar_lea.vmem (!%p3401_p5), [#allocation3], %s2266_s28 }
  0x46   : > { %2776 = dma.done.wait (%p3402_p6), %s309_s15, 512  }
  0x47   : > { %2778 = vsyncadd (%p3402_p6), %s309_s15, 4294966784  ;;  %p3403_p13 = scmp.eq.s32.totalorder %s2881_s7, 0 }
  0x49   : > { %2780 = dma.done.wait (%p3403_p13), [#allocation7], 128   ;;  %p3404_p3 = pmov %p3403_p13 }
  0x4a   : > { %s2269_s9 = sshll.u32 %s2881_s7, 2  ;;  %v2807_v0 = vmov 0   ;;  %v3001_v5 = vld [vmem:[%s3380_s3 + $0x18] sm:$0xff]  ;;  %v3007_v6 = vld [vmem:[%s3380_s3 + $0x10] sm:$0xff]  ;;  %v3013_v7 = vld [vmem:[%s3380_s3 + $0x8] sm:$0xff]  ;;  %vm431_vm0 = vcmask 261120  }
  0x4b   : > { %2782 = vsyncadd (%p3404_p3), [#allocation7], 4294967168  ;;  %2677 = vset.pattern.permute.xlu0 %v2807_v0  ;;  %p355_p12 = scmp.lt.s32.totalorder %s2269_s9, 7  ;;  %2678 = vset.pattern.permute.xlu1 %v2807_v0  ;;  %v1619_v8 = vld [vmem:[%s3379_s2] sm:$0xff]  ;;  %v2808_v23 = vmov 0.0   ;;  %vm2809_vm1 = vmmov 0  }
  0x4c   : > { %2432 = vmatprep.subr.mxu0 %v3001_v5  ;;  %v3023_v9 = vld [vmem:[%s3380_s3] sm:$0xff]  ;;  %2446 = vmatprep.subr.mxu1 %v2808_v23  ;;  %v3051_v24 = vld [vmem:[%s3380_s3 + $0x38] sm:$0xff]  ;;  %v3056_v25 = vld [vmem:[%s3380_s3 + $0x30] sm:$0xff]  ;;  %vm533_vm2 = vcmask 64512   ;;  %vm1671_vm3 = vcmask 1041409   ;;  %vm1673_vm4 = vcmask 1042434  }
  0x4d   : > { %s3414_s9 = smov (!%p355_p12, %s2269_s9), 7  ;;  %2433 = vmatpush3.msra.mxu0 %v3001_v5  ;;  %v2271_v10 = vld [vmem:[#allocation6] ss:$0 sm:$0xff]  ;;  %2448 = vmatprep.mubr.msk.f32.mxu1 %vm2809_vm1, %v2808_v23  ;;  %v3062_v27 = vld [vmem:[#allocation6 + $0x1] ss:$0 sm:$0xff]  ;;  %v3076_v38 = vld [vmem:[%s2984_s11 + $0x8] sm:$0xff] }
  0x4e   : > { %s2270_s20 = sshll.u32 %s3414_s9, 3  ;;  %2434 = vmatprep.subr.mxu0 %v3007_v6  ;;  %v3067_v33 = vld [vmem:[%s2984_s11] sm:$0xff]  ;;  %v3085_v40 = vld [vmem:[%s2984_s11 + $0x10] sm:$0xff]  ;;  %v3093_v42 = vld [vmem:[%s2984_s11 + $0x18] sm:$0xff]  ;;  %vm1675_vm5 = vcmask 1043459   ;;  %vm2105_vm6 = vcmask 130048  }
  0x4f   : > { %s358_s23 = scalar_lea.vmem %s3377_s0, %s2270_s20  ;;  %2435 = vmatpush3.msra.mxu0 %v3007_v6  ;;  %v3100_v43 = vld [vmem:[%s3380_s3 + $0x28] sm:$0xff]  ;;  %v3107_v44 = vld [vmem:[%s3380_s3 + $0x20] sm:$0xff]  ;;  %v3127_v53 = vld [vmem:[%s3380_s3 + $0x58] sm:$0xff]  ;;  %s2118_s14 = sld [smem:[#allocation2]]  ;;  %vm2150_vm7 = vcmask 60416  }
  0x50   : > { %v361_v1 = vld [vmem:[%s358_s23] sm:$0xff]  ;;  %v363_v2 = vld [vmem:[%s358_s23 + $0x10] sm:$0xff]  ;;  %v362_v3 = vld [vmem:[%s358_s23 + $0x8] sm:$0xff]  ;;  %2436 = vmatprep.subr.mxu0 %v3013_v7  ;;  %s2268_s11 = sshll.u32 %s2980_s26, 2  ;;  %s2338_s21 = sshll.u32 %s2881_s7, 6 }
  0x51   : > { %368 = vperm.xlu0 %2677, %v361_v1   ;;  %378 = vperm.xlu1 %2678, %v363_v2   ;;  %v364_v4 = vld [vmem:[%s358_s23 + $0x18] sm:$0xff]  ;;  %v3134_v54 = vld [vmem:[%s3380_s3 + $0x50] sm:$0xff]  ;;  %v3141_v55 = vld [vmem:[%s3380_s3 + $0x48] sm:$0xff]  ;;  %s353_s27 = scalar_lea.vmem [#allocation8], %s2268_s11  ;;  %s3339_s9 = scalar_lea.hbm %s3385_s8, %s2338_s21 }
  0x52   : > { %2437 = vmatpush3.msra.mxu0 %v3013_v7  ;;  %v3147_v56 = vld [vmem:[%s3380_s3 + $0x40] sm:$0xff]  ;;  %s2166_s22 = sshll.u32 %s353_s27, 4  ;;  %s2153_s7 = scalar_lea.sflag [#allocation5], %s2980_s26  ;;  %s2167_s22 = int_to_ptr.vmem [resolvable:$true] %s2166_s22 }
  0x53   : > { %2438 = vmatprep.subr.mxu0 %v3023_v9  ;;  %v3153_v57 = vld [vmem:[#allocation6 + $0x2] ss:$0 sm:$0xff]  ;;  %s2733_s20 = scalar_lea.vmem %s2167_s22, 64  ;;  %p3405_p7 = scmp.ne.s32.totalorder %s3395_s18, 0 }
  0x54   : > { %2439 = vmatpush3.msra.mxu0 %v3023_v9  ;;  %p2734_p1 = scmp.ne.s32.totalorder %s2167_s22, %s2733_s20  ;;  %s2811_s25 = smov [#allocation8]  }
  0x55   : > { %373 = vperm.xlu0 %2677, %v362_v3   ;;  %383 = vperm.xlu1 %2678, %v364_v4   ;;  %s2737_s16 = sshll.u32 %s2811_s25, 4  ;;  %s2738_s16 = int_to_ptr.vmem [resolvable:$false] %s2737_s16 }
  0x56   : > { %2466 = vmatprep.subr.mxu0 %v3051_v24  ;;  %p2735_p8 = pnand %p2734_p1, %p3405_p7  ;;  %s2739_s23 = scalar_lea.vmem %s2738_s16, 128 }
  0x57   : > { %p2740_p10 = scmp.lt.s32.totalorder %s2167_s22, %s2738_s16  ;;  %p2741_p2 = scmp.lt.s32.totalorder %s2739_s23, %s2733_s20 }
  0x58   : > { %p2736_p9 = pneg %p2735_p8 }
  0x59   : > { %1622 = vperm.xlu0 %2677, %v1619_v8   ;;  %p2742_p0 = por %p2741_p2, %p2740_p10 }
  0x5b   : > { %p2743_p4 = pnand %p2742_p0, %p2736_p9 }
  0xcc   : > { %v369_v11 = vpop.permute.xlu0 %368  ;;  %v379_v12 = vpop.permute.xlu1 %378 }
  0xcd   : > { %v390_v13 = vmul.f32 %v2271_v10, %v369_v11  ;;  %v392_v14 = vmul.f32 %v2271_v10, %v379_v12 }
  0xcf   : > { %v3029_v15 = vmax.f32 %v390_v13, 0.0  ;;  %v3033_v20 = vmax.f32 %v392_v14, 0.0 }
  0xd0   : > { %v374_v16 = vpop.permute.xlu0 %373  ;;  %v384_v17 = vpop.permute.xlu1 %383 }
  0xd1   : > { %v391_v18 = vmul.f32 %v2271_v10, %v374_v16  ;;  %2440 = vmatprep.mubr.msk.f32.mxu0 %vm431_vm0, %v3029_v15  ;;  %v393_v19 = vmul.f32 %v2271_v10, %v384_v17 }
  0xd3   : > { %v3035_v21 = vmax.f32 %v391_v18, 0.0  ;;  %v3037_v22 = vmax.f32 %v393_v19, 0.0 }
  0xd5   : > { %2441 = vmatmul.mubr.msk.f32.vlgmr.msra.gmra.mxu0 %vm431_vm0, %v3035_v21 }
  0xd6   : > { %2443 = vmatprep.mubr.msk.f32.mxu0 %vm431_vm0, %v3033_v20  ;;  %2467 = vmatpush3.msra.mxu0 %v3051_v24 }
  0xd7   : > { %2468 = vmatprep.subr.mxu0 %v3056_v25 }
  0xd8   : > { %2469 = vmatpush3.msra.mxu0 %v3056_v25 }
  0xd9   : > { %2444 = vmatmul.mubr.msk.f32.gmra.mxu0 %vm431_vm0, %v3037_v22  ;;  %2470 = vmatprep.subr.mxu0 %v3100_v43 }
  0xda   : > { %2471 = vmatpush3.msra.mxu0 %v3100_v43 }
  0xdb   : > { %2472 = vmatprep.subr.mxu0 %v3107_v44 }
  0xdc   : > { %2473 = vmatpush3.msra.mxu0 %v3107_v44 }
  0xdd   : > { %2494 = vmatprep.subr.mxu0 %v3001_v5 }
 0x195   : > { %v2442_v26 = vpop.f32.mrf.mxu0 }
 0x196   : > { %v516_v29 = vadd.f32 %v2442_v26, %v3062_v27 }
 0x197   : > { %v510_v28 = vpop.f32.mrf.mxu0 }
 0x198   : > { %v511_v30 = vadd.f32 %v3062_v27, %v510_v28  ;;  %v530_v35 = vmax.f32 %v516_v29, 0.0 }
 0x199   : > { %v2445_v31 = vpop.f32.mrf.mxu0 }
 0x19a   : > { %v529_v32 = vmax.f32 %v511_v30, 0.0  ;;  %v526_v39 = vadd.f32 %v2445_v31, %v3062_v27 }
 0x19b   : > { %v520_v34 = vpop.f32.mrf.mxu0 }
 0x19c   : > { %v521_v36 = vadd.f32 %v3062_v27, %v520_v34  ;;  %2447 = vmatpush3.msra.mxu1 %v529_v32  ;;  %v532_v41 = vmax.f32 %v526_v39, 0.0 }
 0x19d   : > { %2449 = vmatmul.mubr.msk.f32.vlgmr.msra.gmra.mxu1 %vm533_vm2, %v3067_v33  ;;  %2451 = vmatprep.subr.mxu1 %v2808_v23 }
 0x19e   : > { %v531_v37 = vmax.f32 %v521_v36, 0.0  ;;  %2452 = vmatpush3.msra.mxu1 %v530_v35  ;;  %2453 = vmatprep.mubr.msk.f32.mxu1 %vm2809_vm1, %v2808_v23 }
 0x19f   : > { %2456 = vmatprep.subr.mxu1 %v2808_v23 }
 0x1a1   : > { %2454 = vmatmul.mubr.msk.f32.vlgmr.msra.gmra.mxu1 %vm533_vm2, %v3076_v38 }
 0x1a2   : > { %2457 = vmatpush3.msra.mxu1 %v531_v37  ;;  %2458 = vmatprep.mubr.msk.f32.mxu1 %vm2809_vm1, %v2808_v23 }
 0x1a3   : > { %2461 = vmatprep.subr.mxu1 %v2808_v23 }
 0x1a5   : > { %2459 = vmatmul.mubr.msk.f32.vlgmr.msra.gmra.mxu1 %vm533_vm2, %v3085_v40 }
 0x1a6   : > { %2462 = vmatpush3.msra.mxu1 %v532_v41  ;;  %2463 = vmatprep.mubr.msk.f32.mxu1 %vm2809_vm1, %v2808_v23 }
 0x1a7   : > { %2480 = vmatprep.subr.mxu1 %v3127_v53 }
 0x1a9   : > { %2464 = vmatmul.mubr.msk.f32.vlgmr.msra.gmra.mxu1 %vm533_vm2, %v3093_v42 }
 0x1aa   : > { %2481 = vmatpush3.msra.mxu1 %v3127_v53 }
 0x1ab   : > { %2482 = vmatprep.subr.mxu1 %v3134_v54 }
 0x1ac   : > { %2483 = vmatpush3.msra.mxu1 %v3134_v54 }
 0x1ad   : > { %2484 = vmatprep.subr.mxu1 %v3141_v55 }
 0x1ae   : > { %2485 = vmatpush3.msra.mxu1 %v3141_v55 }
 0x1af   : > { %2486 = vmatprep.subr.mxu1 %v3147_v56 }
 0x1b0   : > { %2487 = vmatpush3.msra.mxu1 %v3147_v56 }
 0x1b1   : > { %2606 = vmatprep.subr.mxu1 %v3001_v5 }
 0x25d   : > { %v603_v45 = vpop.f32.mrf.mxu1 }
 0x25e   : > { %2474 = vmatprep.mubr.msk.f32.mxu0 %vm431_vm0, %v603_v45 }
 0x25f   : > { %v2450_v46 = vpop.f32.mrf.mxu1 }
 0x261   : > { %v676_v47 = vpop.f32.mrf.mxu1 }
 0x262   : > { %2475 = vmatmul.mubr.msk.f32.vlgmr.msra.gmra.mxu0 %vm431_vm0, %v676_v47 }
 0x263   : > { %v2455_v48 = vpop.f32.mrf.mxu1  ;;  %2495 = vmatpush3.msra.mxu0 %v3001_v5 }
 0x264   : > { %2496 = vmatprep.subr.mxu0 %v3007_v6 }
 0x265   : > { %v749_v49 = vpop.f32.mrf.mxu1  ;;  %2497 = vmatpush3.msra.mxu0 %v3007_v6 }
 0x266   : > { %2477 = vmatprep.mubr.msk.f32.mxu0 %vm431_vm0, %v749_v49  ;;  %2498 = vmatprep.subr.mxu0 %v3013_v7 }
 0x267   : > { %v2460_v50 = vpop.f32.mrf.mxu1  ;;  %2499 = vmatpush3.msra.mxu0 %v3013_v7 }
 0x268   : > { %2500 = vmatprep.subr.mxu0 %v3023_v9 }
 0x269   : > { %v822_v51 = vpop.f32.mrf.mxu1  ;;  %2501 = vmatpush3.msra.mxu0 %v3023_v9 }
 0x26a   : > { %2478 = vmatmul.mubr.msk.f32.gmra.mxu0 %vm431_vm0, %v822_v51  ;;  %2513 = vmatprep.subr.mxu0 %v2808_v23 }
 0x26b   : > { %v2465_v52 = vpop.f32.mrf.mxu1 }
 0x322   : > { %v2476_v58 = vpop.f32.mrf.mxu0 }
 0x323   : > { %v910_v59 = vadd.f32 %v2476_v58, %v3153_v57 }
 0x324   : > { %v904_v60 = vpop.f32.mrf.mxu0 }
 0x325   : > { %v905_v61 = vadd.f32 %v3153_v57, %v904_v60  ;;  %v924_v63 = vmax.f32 %v910_v59, 0.0 }
 0x327   : > { %v923_v62 = vmax.f32 %v905_v61, 0.0  ;;  %v2324_v61 = vld [vmem:[%s3380_s3 + $0x98] sm:$0xff] }
 0x329   : > { %2488 = vmatprep.mubr.msk.f32.mxu1 %vm431_vm0, %v923_v62  ;;  %v2323_v62 = vld [vmem:[%s3380_s3 + $0x90] sm:$0xff] }
 0x32a   : > { %v2479_v0 = vpop.f32.mrf.mxu0  ;;  %2489 = vmatmul.mubr.msk.f32.vlgmr.msra.gmra.mxu1 %vm431_vm0, %v924_v63  ;;  %v2321_v63 = vld [vmem:[%s3380_s3 + $0x80] sm:$0xff] }
 0x32b   : > { %2610 = vmatpush3.msra.mxu1 %v3001_v5  ;;  %v920_v1 = vadd.f32 %v2479_v0, %v3153_v57  ;;  %v3171_v5 = vld [vmem:[#allocation6 + $0x3] ss:$0 sm:$0xff]  ;;  %v2318_v0 = vld [vmem:[%s3380_s3 + $0x78] sm:$0xff] }
 0x32c   : > { %v914_v2 = vpop.f32.mrf.mxu0  ;;  %2607 = vmatprep.subr.mxu1 %v3007_v6 }
 0x32d   : > { %v915_v3 = vadd.f32 %v3153_v57, %v914_v2  ;;  %2611 = vmatpush3.msra.mxu1 %v3007_v6  ;;  %v926_v8 = vmax.f32 %v920_v1, 0.0  ;;  %v2317_v1 = vld [vmem:[%s3380_s3 + $0x70] sm:$0xff]  ;;  %v2316_v2 = vld [vmem:[%s3380_s3 + $0x68] sm:$0xff] }
 0x32e   : > { %2608 = vmatprep.subr.mxu1 %v3013_v7 }
 0x32f   : > { %v925_v4 = vmax.f32 %v915_v3, 0.0  ;;  %2612 = vmatpush3.msra.mxu1 %v3013_v7  ;;  %v2315_v3 = vld [vmem:[%s3380_s3 + $0x60] sm:$0xff] }
 0x330   : > { %2609 = vmatprep.subr.mxu1 %v3023_v9 }
 0x331   : > { %2491 = vmatprep.mubr.msk.f32.mxu1 %vm431_vm0, %v925_v4  ;;  %2613 = vmatpush3.msra.mxu1 %v3023_v9  ;;  %v1936_v4 = vld [vmem:[%s3382_s5 + $0x38] sm:$0xff] }
 0x332   : > { %2492 = vmatmul.mubr.msk.f32.gmra.mxu1 %vm431_vm0, %v926_v8  ;;  %2508 = vmatprep.subr.mxu1 %v2808_v23 }
 0x3ea   : > { %v2490_v10 = vpop.f32.mrf.mxu1 }
 0x3eb   : > { %v1011_v6 = vadd.f32 %v2490_v10, %v3171_v5 }
 0x3ec   : > { %v1005_v11 = vpop.f32.mrf.mxu1 }
 0x3ed   : > { %v1006_v12 = vadd.f32 %v3171_v5, %v1005_v11  ;;  %v1025_v7 = vadd.f32 %v1011_v6, %v3035_v21 }
 0x3ef   : > { %v1024_v13 = vadd.f32 %v1006_v12, %v3029_v15  ;;  %v1029_v16 = vmax.f32 %v1025_v7, 0.0 }
 0x3f1   : > { %v1028_v14 = vmax.f32 %v1024_v13, 0.0 }
 0x3f2   : > { %v2493_v17 = vpop.f32.mrf.mxu1 }
 0x3f3   : > { %v1021_v9 = vadd.f32 %v2493_v17, %v3171_v5  ;;  %2502 = vmatprep.mubr.msk.f32.mxu0 %vm431_vm0, %v1028_v14  ;;  %v1623_v14 = vpop.permute.xlu0 %1622 }
 0x3f4   : > { %v1015_v18 = vpop.f32.mrf.mxu1  ;;  %2503 = vmatmul.mubr.msk.f32.vlgmr.msra.gmra.mxu0 %vm431_vm0, %v1029_v16 }
 0x3f5   : > { %v1016_v19 = vadd.f32 %v3171_v5, %v1015_v18  ;;  %2515 = vmatprep.mubr.msk.f32.mxu0 %vm2809_vm1, %v2808_v23  ;;  %v1027_v26 = vadd.f32 %v1021_v9, %v3037_v22 }
 0x3f7   : > { %v1026_v28 = vadd.f32 %v1016_v19, %v3033_v20  ;;  %v1031_v30 = vmax.f32 %v1027_v26, 0.0 }
 0x3f9   : > { %v1030_v29 = vmax.f32 %v1026_v28, 0.0 }
 0x3fb   : > { %2505 = vmatprep.mubr.msk.f32.mxu1 %vm431_vm0, %v1030_v29 }
 0x3fc   : > { %2506 = vmatmul.mubr.msk.f32.vlgmr.msra.gmra.mxu1 %vm431_vm0, %v1031_v30 }
 0x3fd   : > { %2510 = vmatprep.mubr.msk.f32.mxu1 %vm2809_vm1, %v2808_v23 }
 0x4b4   : > { %v2504_v31 = vpop.f32.mrf.mxu0 }
 0x4b5   : > { %v1116_v32 = vadd.f32 %v2504_v31, %v3062_v27 }
 0x4b6   : > { %v1110_v34 = vpop.f32.mrf.mxu0 }
 0x4b7   : > { %v1130_v35 = vmax.f32 %v1116_v32, 0.0  ;;  %v1111_v36 = vadd.f32 %v3062_v27, %v1110_v34 }
 0x4b9   : > { %v1129_v37 = vmax.f32 %v1111_v36, 0.0  ;;  %2514 = vmatpush3.msra.mxu0 %v1130_v35 }
 0x4ba   : > { %2516 = vmatmul.mubr.msk.f32.vlgmr.msra.gmra.mxu0 %vm533_vm2, %v3076_v38  ;;  %2523 = vmatprep.subr.mxu0 %v2808_v23 }
 0x4bb   : > { %2509 = vmatpush3.msra.mxu1 %v1129_v37  ;;  %2525 = vmatprep.mubr.msk.f32.mxu0 %vm2809_vm1, %v2808_v23 }
 0x4bc   : > { %v2507_v39 = vpop.f32.mrf.mxu1  ;;  %2511 = vmatmul.mubr.msk.f32.vlgmr.msra.gmra.mxu1 %vm533_vm2, %v3067_v33  ;;  %2518 = vmatprep.subr.mxu1 %v2808_v23 }
 0x4bd   : > { %v1126_v41 = vadd.f32 %v2507_v39, %v3062_v27  ;;  %2520 = vmatprep.mubr.msk.f32.mxu1 %vm2809_vm1, %v2808_v23 }
 0x4be   : > { %v1120_v45 = vpop.f32.mrf.mxu1 }
 0x4bf   : > { %v1132_v46 = vmax.f32 %v1126_v41, 0.0  ;;  %v1121_v38 = vadd.f32 %v3062_v27, %v1120_v45 }
 0x4c1   : > { %v1131_v47 = vmax.f32 %v1121_v38, 0.0  ;;  %2524 = vmatpush3.msra.mxu0 %v1132_v46 }
 0x4c2   : > { %2526 = vmatmul.mubr.msk.f32.vlgmr.msra.gmra.mxu0 %vm533_vm2, %v3093_v42  ;;  %2542 = vmatprep.subr.mxu0 %v3127_v53 }
 0x4c3   : > { %2519 = vmatpush3.msra.mxu1 %v1131_v47  ;;  %2543 = vmatpush3.msra.mxu0 %v3127_v53 }
 0x4c4   : > { %2521 = vmatmul.mubr.msk.f32.vlgmr.msra.gmra.mxu1 %vm533_vm2, %v3085_v40  ;;  %2528 = vmatprep.subr.mxu1 %v3051_v24 }
 0x4c5   : > { %2529 = vmatpush3.msra.mxu1 %v3051_v24  ;;  %2544 = vmatprep.subr.mxu0 %v3134_v54 }
 0x4c6   : > { %2530 = vmatprep.subr.mxu1 %v3056_v25  ;;  %2545 = vmatpush3.msra.mxu0 %v3134_v54 }
 0x4c7   : > { %2531 = vmatpush3.msra.mxu1 %v3056_v25  ;;  %2546 = vmatprep.subr.mxu0 %v3141_v55 }
 0x4c8   : > { %2532 = vmatprep.subr.mxu1 %v3100_v43  ;;  %2547 = vmatpush3.msra.mxu0 %v3141_v55 }
 0x4c9   : > { %2533 = vmatpush3.msra.mxu1 %v3100_v43  ;;  %2548 = vmatprep.subr.mxu0 %v3147_v56 }
 0x4ca   : > { %2534 = vmatprep.subr.mxu1 %v3107_v44  ;;  %2549 = vmatpush3.msra.mxu0 %v3147_v56 }
 0x4cb   : > { %2535 = vmatpush3.msra.mxu1 %v3107_v44  ;;  %2567 = vmatprep.subr.mxu0 %v2324_v61 }
 0x4cc   : > { %2556 = vmatprep.subr.mxu1 %v2808_v23 }
 0x57a   : > { %v1269_v24 = vpop.f32.mrf.mxu0 }
 0x57c   : > { %v1199_v25 = vpop.f32.mrf.mxu1  ;;  %v2517_v27 = vpop.f32.mrf.mxu0 }
 0x57d   : > { %2536 = vmatprep.mubr.msk.f32.mxu1 %vm431_vm0, %v1199_v25 }
 0x57e   : > { %2537 = vmatmul.mubr.msk.f32.vlgmr.msra.gmra.mxu1 %vm431_vm0, %v1269_v24  ;;  %v2512_v33 = vpop.f32.mrf.mxu1 }
 0x57f   : > { %2557 = vmatpush3.msra.mxu1 %v2318_v0  ;;  %v1856_v0 = vld [vmem:[%s3382_s5] sm:$0xff] }
 0x580   : > { %2558 = vmatprep.subr.mxu1 %v2808_v23 }
 0x581   : > { %2559 = vmatpush3.msra.mxu1 %v2317_v1 }
 0x582   : > { %v1409_v40 = vpop.f32.mrf.mxu0  ;;  %2560 = vmatprep.subr.mxu1 %v2808_v23 }
 0x583   : > { %2561 = vmatpush3.msra.mxu1 %v2316_v2  ;;  %v2325_v2 = vld [vmem:[#allocation6 + $0x5] ss:$0 sm:$0xff] }
 0x584   : > { %v1339_v42 = vpop.f32.mrf.mxu1  ;;  %v2527_v43 = vpop.f32.mrf.mxu0  ;;  %2562 = vmatprep.subr.mxu1 %v2808_v23 }
 0x585   : > { %2539 = vmatprep.mubr.msk.f32.mxu1 %vm431_vm0, %v1339_v42  ;;  %2563 = vmatpush3.msra.mxu1 %v2315_v3 }
 0x586   : > { %2540 = vmatmul.mubr.msk.f32.gmra.mxu1 %vm431_vm0, %v1409_v40  ;;  %v2522_v48 = vpop.f32.mrf.mxu1  ;;  %2581 = vmatprep.subr.mxu1 %v2808_v23 }
 0x587   : > { %2564 = vmatprep.mubr.msk.f32.mxu1 %vm2809_vm1, %v2808_v23 }
 0x63e   : > { %v2538_v44 = vpop.f32.mrf.mxu1 }
 0x63f   : > { %v1497_v49 = vadd.f32 %v2538_v44, %v3153_v57 }
 0x640   : > { %v1491_v50 = vpop.f32.mrf.mxu1 }
 0x641   : > { %v1492_v51 = vadd.f32 %v3153_v57, %v1491_v50  ;;  %v1511_v52 = vmax.f32 %v1497_v49, 0.0 }
 0x643   : > { %v1510_v53 = vmax.f32 %v1492_v51, 0.0 }
 0x645   : > { %2550 = vmatprep.mubr.msk.f32.mxu0 %vm431_vm0, %v1510_v53 }
 0x646   : > { %v2541_v54 = vpop.f32.mrf.mxu1  ;;  %2551 = vmatmul.mubr.msk.f32.vlgmr.msra.gmra.mxu0 %vm431_vm0, %v1511_v52 }
 0x647   : > { %v1507_v55 = vadd.f32 %v2541_v54, %v3153_v57  ;;  %2568 = vmatpush3.msra.mxu0 %v2324_v61  ;;  %v1933_v61 = vld [vmem:[%s3382_s5 + $0x20] sm:$0xff] }
 0x648   : > { %v1501_v56 = vpop.f32.mrf.mxu1  ;;  %2569 = vmatprep.subr.mxu0 %v2323_v62 }
 0x649   : > { %v1502_v58 = vadd.f32 %v3153_v57, %v1501_v56  ;;  %v1513_v60 = vmax.f32 %v1507_v55, 0.0  ;;  %2570 = vmatpush3.msra.mxu0 %v2323_v62  ;;  %v2322_v57 = vld [vmem:[%s3380_s3 + $0x88] sm:$0xff]  ;;  %v1859_v62 = vld [vmem:[%s3382_s5 + $0x18] sm:$0xff] }
 0x64a   : > { %2571 = vmatprep.subr.mxu0 %v2322_v57 }
 0x64b   : > { %v1512_v59 = vmax.f32 %v1502_v58, 0.0  ;;  %2572 = vmatpush3.msra.mxu0 %v2322_v57  ;;  %v1858_v57 = vld [vmem:[%s3382_s5 + $0x10] sm:$0xff] }
 0x64c   : > { %2573 = vmatprep.subr.mxu0 %v2321_v63 }
 0x64d   : > { %2553 = vmatprep.mubr.msk.f32.mxu0 %vm431_vm0, %v1512_v59  ;;  %2574 = vmatpush3.msra.mxu0 %v2321_v63  ;;  %v1935_v59 = vld [vmem:[%s3382_s5 + $0x30] sm:$0xff]  ;;  %v1857_v63 = vld [vmem:[%s3382_s5 + $0x8] sm:$0xff] }
 0x64e   : > { %2554 = vmatmul.mubr.msk.f32.gmra.mxu0 %vm431_vm0, %v1513_v60  ;;  %2592 = vmatprep.subr.mxu0 %v1936_v4  ;;  %v1934_v60 = vld [vmem:[%s3382_s5 + $0x28] sm:$0xff] }
 0x706   : > { %v2552_v8 = vpop.f32.mrf.mxu0 }
 0x707   : > { %v1598_v10 = vadd.f32 %v2552_v8, %v3171_v5 }
 0x708   : > { %v1592_v6 = vpop.f32.mrf.mxu0 }
 0x709   : > { %v1612_v11 = vadd.f32 %v1598_v10, %v3035_v21  ;;  %v1593_v12 = vadd.f32 %v3171_v5, %v1592_v6 }
 0x70b   : > { %v1616_v7 = vmax.f32 %v1612_v11, 0.0  ;;  %v1611_v13 = vadd.f32 %v1593_v12, %v3029_v15 }
 0x70d   : > { %v1626_v16 = vmul.f32 %v1623_v14, %v1616_v7  ;;  %v1615_v17 = vmax.f32 %v1611_v13, 0.0 }
 0x70e   : > { %v2555_v9 = vpop.f32.mrf.mxu0 }
 0x70f   : > { %v1636_v18 = vsel %vm431_vm0, %v1626_v16, 0.0  ;;  %v1625_v19 = vmul.f32 %v1623_v14, %v1615_v17  ;;  %v1608_v26 = vadd.f32 %v2555_v9, %v3171_v5  ;;  %2575 = vmatprep.mubr.msk.f32.mxu0 %vm431_vm0, %v1615_v17  ;;  %v2038_v16 = vlaneseq }
 0x710   : > { %v1637_v28 = vrot.slane %v1636_v18, 4  ;;  %v1602_v29 = vpop.f32.mrf.mxu0  ;;  %2576 = vmatmul.mubr.msk.f32.vlgmr.msra.gmra.mxu0 %vm431_vm0, %v1616_v7 }
 0x711   : > { %v1629_v21 = vsel %vm431_vm0, %v1625_v19, 0.0  ;;  %v1614_v30 = vadd.f32 %v1608_v26, %v3037_v22  ;;  %v1603_v15 = vadd.f32 %v3171_v5, %v1602_v29  ;;  %2593 = vmatpush3.msra.mxu0 %v1936_v4  ;;  %v2039_v17 = vshrl.u32 %v2038_v16, 7 }
 0x712   : > { %v1630_v31 = vrot.slane %v1629_v21, 4  ;;  %v1638_v32 = vadd.f32 %v1637_v28, %v1636_v18  ;;  %2594 = vmatprep.subr.mxu0 %v1935_v59  ;;  %v2129_v9 = vand.u32 127, %v2038_v16  ;;  %v2810_v19 = vmov 1966171168  }
 0x713   : > { %v1618_v34 = vmax.f32 %v1614_v30, 0.0  ;;  %v1613_v35 = vadd.f32 %v1603_v15, %v3033_v20  ;;  %2595 = vmatpush3.msra.mxu0 %v1935_v59  ;;  %v2036_v26 = vunpack.c.l.s4 %v2810_v19 }
 0x714   : > { %v1631_v36 = vadd.f32 %v1630_v31, %v1629_v21  ;;  %v1639_v45 = vrot.slane %v1638_v32, 2  ;;  %2596 = vmatprep.subr.mxu0 %v1934_v60  ;;  %v3320_v18 = vsub.s32 %v2129_v9, %v2039_v17  ;;  %v2061_v31 = vsub.s32 0, %v2039_v17 }
 0x715   : > { %v1628_v37 = vmul.f32 %v1623_v14, %v1618_v34  ;;  %v1617_v39 = vmax.f32 %v1613_v35, 0.0  ;;  %2597 = vmatpush3.msra.mxu0 %v1934_v60  ;;  %v2037_v28 = vunpack.c.0.s8 %v2036_v26 }
 0x716   : > { %v1632_v41 = vrot.slane %v1631_v36, 2  ;;  %v1640_v27 = vadd.f32 %v1639_v45, %v1638_v32  ;;  %2598 = vmatprep.subr.mxu0 %v1933_v61 }
 0x717   : > { %v1650_v46 = vsel %vm431_vm0, %v1628_v37, 0.0  ;;  %v1627_v38 = vmul.f32 %v1623_v14, %v1617_v39  ;;  %2578 = vmatprep.mubr.msk.f32.mxu0 %vm431_vm0, %v1617_v39  ;;  %2599 = vmatpush3.msra.mxu0 %v1933_v61  ;;  %v2040_v29 = vsub.s32 %v2037_v28, %v2039_v17 }
 0x718   : > { %v1651_v47 = vrot.slane %v1650_v46, 4  ;;  %2579 = vmatmul.mubr.msk.f32.gmra.mxu0 %vm431_vm0, %v1618_v34  ;;  %v1633_v22 = vadd.f32 %v1632_v41, %v1631_v36  ;;  %v1641_v48 = vrot.slane %v1640_v27, 1 }
 0x719   : > { %v1643_v5 = vsel %vm431_vm0, %v1627_v38, 0.0 }
 0x71a   : > { %v1652_v24 = vadd.f32 %v1651_v47, %v1650_v46  ;;  %v1644_v25 = vrot.slane %v1643_v5, 4  ;;  %v1634_v40 = vrot.slane %v1633_v22, 1  ;;  %v1642_v52 = vadd.f32 %v1641_v48, %v1640_v27  ;;  %v2335_v46 = vld [vmem:[%s3383_s6] ss:$0 sm:$0xff] }
 0x71c   : > { %v1653_v20 = vrot.slane %v1652_v24, 2  ;;  %v1645_v33 = vadd.f32 %v1644_v25, %v1643_v5  ;;  %v1635_v49 = vadd.f32 %v1634_v40, %v1633_v22  ;;  %v2336_v40 = vld [vmem:[%s3383_s6 + $0x1] ss:$0 sm:$0xff] }
 0x71e   : > { %v1654_v42 = vadd.f32 %v1653_v20, %v1652_v24  ;;  %v1646_v43 = vrot.slane %v1645_v33, 2  ;;  %v1672_v55 = vsel %vm1671_vm3, %v1642_v52, %v1635_v49 }
 0x720   : > { %v1647_v44 = vadd.f32 %v1646_v43, %v1645_v33  ;;  %v1655_v50 = vrot.slane %v1654_v42, 1 }
 0x722   : > { %v1648_v51 = vrot.slane %v1647_v44, 1  ;;  %v1656_v54 = vadd.f32 %v1655_v50, %v1654_v42 }
 0x724   : > { %v1649_v53 = vadd.f32 %v1648_v51, %v1647_v44 }
 0x726   : > { %v1674_v56 = vsel %vm1673_vm4, %v1649_v53, %v1672_v55 }
 0x727   : > { %v1676_v58 = vsel %vm1675_vm5, %v1656_v54, %v1674_v56 }
 0x728   : > { %2565 = vmatmul.mubr.msk.f32.vlgmr.msra.gmra.mxu1 %vm431_vm0, %v1676_v58 }
 0x729   : > { %2589 = vmatprep.mubr.msk.f32.mxu1 %vm2809_vm1, %v2808_v23  ;;  %2582 = vmatpush3.msra.mxu1 %v1859_v62 }
 0x72a   : > { %2583 = vmatprep.subr.mxu1 %v2808_v23 }
 0x72b   : > { %2584 = vmatpush3.msra.mxu1 %v1858_v57  ;;  %v2119_v57 = vstv %s2118_s14 }
 0x72c   : > { %2585 = vmatprep.subr.mxu1 %v2808_v23 }
 0x72d   : > { %2586 = vmatpush3.msra.mxu1 %v1857_v63 }
 0x72e   : > { %2587 = vmatprep.subr.mxu1 %v2808_v23  ;;  %v2319_v23 = vld [vmem:[#allocation6 + $0x4] ss:$0 sm:$0xff] }
 0x72f   : > { %2588 = vmatpush3.msra.mxu1 %v1856_v0 }
 0x7d0   : > { %v2577_v1 = vpop.f32.mrf.mxu0 }
 0x7d1   : > { %v1843_v8 = vadd.f32 %v2577_v1, %v2325_v2 }
 0x7d2   : > { %v1837_v3 = vpop.f32.mrf.mxu0 }
 0x7d3   : > { %v1838_v4 = vadd.f32 %v2325_v2, %v1837_v3 }
 0x7d5   : > { %2600 = vmatprep.mubr.msk.f32.mxu0 %vm431_vm0, %v1838_v4 }
 0x7d6   : > { %2601 = vmatmul.mubr.msk.f32.vlgmr.msra.gmra.mxu0 %vm431_vm0, %v1843_v8 }
 0x7d8   : > { %v2580_v10 = vpop.f32.mrf.mxu0 }
 0x7d9   : > { %v1853_v12 = vadd.f32 %v2580_v10, %v2325_v2 }
 0x7da   : > { %v1847_v6 = vpop.f32.mrf.mxu0 }
 0x7db   : > { %v1848_v11 = vadd.f32 %v2325_v2, %v1847_v6 }
 0x7dd   : > { %2603 = vmatprep.mubr.msk.f32.mxu0 %vm431_vm0, %v1848_v11 }
 0x7de   : > { %2604 = vmatmul.mubr.msk.f32.gmra.mxu0 %vm431_vm0, %v1853_v12 }
 0x7e8   : > { %v1745_v7 = vpop.f32.mrf.mxu1 }
 0x7e9   : > { %v1746_v13 = vadd.f32 %v2319_v23, %v1745_v7 }
 0x7ea   : > { %v2566_v14 = vpop.f32.mrf.mxu1 }
 0x7eb   : > { %2590 = vmatmul.mubr.msk.f32.vlgmr.msra.gmra.mxu1 %vm431_vm0, %v1746_v13 }
 0x896   : > { %v2602_v21 = vpop.f32.mrf.mxu0 }
 0x898   : > { %v2015_v32 = vpop.f32.mrf.mxu0 }
 0x89e   : > { %v2605_v37 = vpop.f32.mrf.mxu0 }
 0x8a0   : > { %v2025_v24 = vpop.f32.mrf.mxu0 }
 0x8ab   : > { %v1929_v30 = vpop.f32.mrf.mxu1 }
 0x8ac   : > { %v2041_v15 = vrot.slane %v1929_v30, %v2040_v29 }
 0x8ad   : > { %v2591_v34 = vpop.f32.mrf.mxu1 }
 0x8ae   : > { %v2042_v35 = vcombine.high %v2041_v15, %v2041_v15  ;;  %v2049_v36 = vrot.slane %v2041_v15, %v2040_v29 }
 0x8b0   : > { %v2056_v39 = vrot.slane %v2042_v35, %v2040_v29  ;;  %v2057_v41 = vcombine.high %v2049_v36, %v2049_v36  ;;  %v2062_v45 = vrot.slane %v2049_v36, %v2061_v31 }
 0x8b2   : > { %v2058_v38 = vcombine.high %v2056_v39, %v2056_v39  ;;  %v2066_v47 = vrot.slane %v2056_v39, %v2061_v31  ;;  %v2070_v22 = vrot.slane %v2057_v41, %v2061_v31  ;;  %v2079_v5 = vadd.f32 %v2062_v45, %v2015_v32 }
 0x8b4   : > { %v2074_v25 = vrot.slane %v2058_v38, %v2061_v31  ;;  %v2088_v27 = vadd.f32 %v2335_v46, %v2079_v5  ;;  %v2080_v20 = vadd.f32 %v2602_v21, %v2066_v47  ;;  %v2081_v33 = vadd.f32 %v2070_v22, %v2025_v24 }
 0x8b6   : > { %v2092_v42 = vmax.f32 %v2088_v27, 0.0  ;;  %v2089_v43 = vadd.f32 %v2335_v46, %v2080_v20  ;;  %v2082_v48 = vadd.f32 %v2605_v37, %v2074_v25  ;;  %v2090_v44 = vadd.f32 %v2335_v46, %v2081_v33 }
 0x8b8   : > { %v2101_v49 = vmul.f32 %v2336_v40, %v2092_v42  ;;  %v2093_v50 = vmax.f32 %v2089_v43, 0.0  ;;  %v2091_v51 = vadd.f32 %v2335_v46, %v2082_v48  ;;  %v2094_v52 = vmax.f32 %v2090_v44, 0.0 }
 0x8ba   : > { %v2106_v53 = vsel %vm2105_vm6, %v2101_v49, 0.0  ;;  %v2102_v54 = vmul.f32 %v2336_v40, %v2093_v50  ;;  %v2095_v55 = vmax.f32 %v2091_v51, 0.0  ;;  %v2103_v59 = vmul.f32 %v2336_v40, %v2094_v52 }
 0x8bb   : > { %2107 = vadd.xlane.f32.xlu1 %v2106_v53 }
 0x8bc   : > { %v2109_v56 = vsel %vm2105_vm6, %v2102_v54, 0.0  ;;  %v2104_v58 = vmul.f32 %v2336_v40, %v2095_v55  ;;  %v2112_v61 = vsel %vm2105_vm6, %v2103_v59, 0.0 }
 0x8bd   : > { %2110 = vadd.xlane.f32.xlu0 %v2109_v56 }
 0x8be   : > { %v2115_v60 = vsel %vm2105_vm6, %v2104_v58, 0.0 }
 0x8bf   : > { %2116 = vadd.xlane.f32.xlu1 %v2115_v60 }
 0x8c1   : > { %2113 = vadd.xlane.f32.xlu0 %v2112_v61 }
 0x944   : > { %v2108_v62 = vpop.xlane.xlu1 %2107 }
 0x945   : > { %v2120_v1 = vadd.f32 %v2119_v57, %v2108_v62 }
 0x946   : > { %v2111_v63 = vpop.xlane.xlu0 %2110 }
 0x947   : > { %v2121_v0 = vadd.f32 %v2119_v57, %v2111_v63  ;;  %v2133_v6 = vrot.slane %v2120_v1, %v3320_v18 }
 0x948   : > { %v2117_v2 = vpop.xlane.xlu1 %2116 }
 0x949   : > { %v2137_v3 = vrot.slane %v2121_v0, %v3320_v18  ;;  %v2123_v4 = vadd.f32 %v2119_v57, %v2117_v2 }
 0x94a   : > { %v2114_v8 = vpop.xlane.xlu0 %2113 }
 0x94b   : > { %v2122_v10 = vadd.f32 %v2119_v57, %v2114_v8  ;;  %v2146_v12 = vsel %vm1671_vm3, %v2137_v3, %v2133_v6  ;;  %v2145_v23 = vrot.slane %v2123_v4, %v3320_v18 }
 0x94d   : > { %v2141_v11 = vrot.slane %v2122_v10, %v3320_v18 }
 0x94f   : > { %v2147_v7 = vsel %vm1673_vm4, %v2141_v11, %v2146_v12 }
 0x950   : > { %v2148_v13 = vsel %vm1675_vm5, %v2145_v23, %v2147_v7 }
 0x951   : > { %2151 = vst.msk [vmem:[%s353_s27] sm:$0xf] %vm2150_vm7, %v2148_v13 }
 0x952   : > { %2746 = shalt.err (!%p2743_p4)
}
 0x953   : > { %s2747_s17 = scalar_lea.hbm %s3339_s9, 64  ;;  %s2751_s13 = scalar_lea.hbm %s3385_s8, 128 }
 0x954   : > { %p2748_p11 = scmp.ne.s32.totalorder %s3339_s9, %s2747_s17  ;;  %p2752_p13 = scmp.lt.s32.totalorder %s3339_s9, %s3385_s8 }
 0x955   : > { %p2753_p3 = scmp.lt.s32.totalorder %s2751_s13, %s2747_s17 }
 0x956   : > { %p2749_p5 = pnand %p2748_p11, %p3405_p7 }
 0x957   : > { %p2754_p12 = por %p2753_p3, %p2752_p13 }
 0x958   : > { %p2750_p6 = pneg %p2749_p5 }
 0x95a   : > { %p2755_p1 = pnand %p2754_p12, %p2750_p6 }
 0x95c   : > { %2758 = shalt.err (!%p2755_p1)
}
 0x95d   : > { %2620 = dma.vmem_to_hbm [thread:$0]  (%p3405_p7), %s2167_s22, 64, %s3339_s9, %s2153_s7  }
 0x95e PF: > { %s2178_s21 = sand.u32 1, %s2789_s29   ;;  %p3406_p8 = scmp.ne.s32.totalorder %s3396_s19, 0 }
 0x95f   : > { %p3407_p9 = scmp.ge.s32.totalorder %s2801_s10, 2  ;;  %s2179_s27 = scalar_lea.sflag [#allocation5], %s2178_s21 }
 0x961   : > { %p2631_p10 = pnand %p3407_p9, %p3406_p8 }
 0x963   : > { %p2632_p2 = pneg %p2631_p10 }
 0x965   : > { %2784 = dma.done.wait (%p2632_p2), %s2179_s27, 64  }
 0x966   : > { %2786 = vsyncadd (%p2632_p2), %s2179_s27, 4294967232  ;;  %s3408_s28 = sld [smem:[#allocation12_spill]]  ;;  %p23_p0 = scmp.ge.s32.totalorder %s2885_s12, 4  }
 0x967   : > { %s3409_s9 = sld [smem:[#allocation13_spill]]  ;;  %s3410_s29 = smov %s2793_s30 }
 0x968   : > { %s3412_s10 = smov %s2885_s12  ;;  %25 = sbr.rel (!%p23_p0) target bundleno = 8 (0x8), region = 108 }
 0x96c   : > { %s3411_s30 = smov %s3408_s28 }
 0x96d   :  { %2184 = vsyncpa [#allocation4], 1 }
 0x96e   :  { %2186 = vsyncpa [#allocation4 + $0x1], 1 }
 0x96f   :  { %2187 = vsyncpa [#allocation7], 1 }
 0x970   :  { %2188 = vsyncpa [#allocation5], 1 }
 0x971   :  { %2190 = vsyncpa [#allocation5 + $0x1], 1 }

</bundles_post_ra>
